<compile_context>
chip_gen: v7x
topology: tpu7x:2x2x1
jax: 0.10.0
libtpu: 0.0.40
codegen_flags: <defaults>
</compile_context>

<pallas_src>
import functools

import jax
import jax.numpy as jnp
from jax.experimental import pallas as pl
from jax.experimental.pallas import tpu as pltpu

_NEG_BIG = -1e30          # finite "-inf" sentinel for masked softmax logits
_VMEM_BUDGET = 24 * 1024 * 1024
_VMEM_LIMIT = 48 * 1024 * 1024


# --------------------------------------------------------------------------- #
# Pass 1: fused first-layer matmul + attention logits + per-tile softmax stats #
# --------------------------------------------------------------------------- #
def _addmil_pass1_kernel(h_ref, wcat_ref, b1a_ref, w2a_ref, b2a_ref,
                         zlog_ref, stats_ref, *, l2, l2p, tn, n_valid):
    i = pl.program_id(0)

    h = h_ref[...]                                                     # (TN, D)

    # Fused first-layer matmul for both branches: h @ [w1a | w1c].
    z = jnp.dot(h, wcat_ref[...], preferred_element_type=jnp.float32)  # (TN, 2*L2p)
    za = jnp.tanh(z[:, :l2p] + b1a_ref[...])                           # (TN, L2p)
    zc = z[:, l2p:]                                                    # (TN, L2p) = h @ w1c (no bias yet)

    # Attention logits: VPU multiply + lane reduce (no 1-lane MXU matmul).
    logit = jnp.sum(za * w2a_ref[...], axis=-1, keepdims=True) + b2a_ref[...]  # (TN, 1)

    # Mask rows past the true bag size (zero-padded rows of the last tile).
    row = i * tn + jax.lax.broadcasted_iota(jnp.int32, (tn, 1), 0)
    logit = jnp.where(row < n_valid, logit, _NEG_BIG)

    # Per-tile softmax statistics; combined across tiles in the wrapper so this
    # grid axis stays "parallel" (megacore-friendly on v7x).
    t_max = jnp.max(logit)
    t_sum = jnp.sum(jnp.exp(logit - t_max))
    lane8 = jax.lax.broadcasted_iota(jnp.int32, (8, 128), 1)
    stats_ref[...] = jnp.where(lane8 == 0, t_max, t_sum)               # lane0=max, others=sumexp

    # Lane-dense intermediate: stash the logit into the zero-padded lane `l2`
    # of h@w1c (l2p > l2 by construction) -> single select + single full store.
    lane = jax.lax.broadcasted_iota(jnp.int32, (tn, l2p), 1)
    zlog_ref[...] = jnp.where(lane == l2, logit, zc)


# --------------------------------------------------------------------------- #
# Pass 2: softmax-weighted classifier, patch preds + per-tile Y_prob partials. #
# --------------------------------------------------------------------------- #
def _addmil_pass2_kernel(zlog_ref, m_ref, invs_ref, b1c_ref, w2c_ref, b2c_ref,
                         pp_ref, ypart_ref, *, l2, l2p, cp, tn, n_valid):
    i = pl.program_id(0)

    zl = zlog_ref[...]                                                 # (TN, L2p)

    # Recover the logit from its stashed lane via a lane reduce (XLU slot).
    lane = jax.lax.broadcasted_iota(jnp.int32, (tn, l2p), 1)
    logit = jnp.sum(jnp.where(lane == l2, zl, 0.0), axis=1, keepdims=True)  # (TN, 1)

    # Attention weights from the global softmax statistics.
    at = jnp.exp(logit - m_ref[...]) * invs_ref[...]                   # (TN, 1)

    # (At * h) @ w1c == At * (h @ w1c): h never re-read, `gated` never built.
    # Lane l2 holds the stashed logit but w2c's row l2 is zero-padded, so it
    # contributes nothing to pp — no masking needed.
    c1 = jnp.maximum(at * zl + b1c_ref[...], 0.0)                      # (TN, L2p)
    pp = jnp.tanh(jnp.dot(c1, w2c_ref[...], preferred_element_type=jnp.float32)
                  + b2c_ref[...])                                      # (TN, Cp)

    pp_ref[...] = pp                                                   # lane-dense store

    # Masked per-tile partial sum for Y_prob (grid axis stays "parallel").
    row = i * tn + jax.lax.broadcasted_iota(jnp.int32, (tn, 1), 0)
    pp_m = jnp.where(row < n_valid, pp, 0.0)
    part = jnp.sum(pp_m, axis=0, keepdims=True)                        # (1, Cp)
    ypart_ref[...] = jnp.broadcast_to(part, (8, cp))                   # dense sublane-broadcast store


# --------------------------------------------------------------------------- #
# Wrapper                                                                      #
# --------------------------------------------------------------------------- #
def _round_up(x, m):
    return ((x + m - 1) // m) * m


def _pad2(a, rows, cols):
    pr, pc = rows - a.shape[0], cols - a.shape[1]
    if pr == 0 and pc == 0:
        return a
    return jnp.pad(a, ((0, pr), (0, pc)))


def addmil_forward(h, params, block_rows=1024):
    """ADDMIL forward. h: (1, N, D) or (N, D). Returns dict like the PyTorch module."""
    if h.ndim == 3:
        h = h[0]                                    # h.squeeze(0)
    h = h.astype(jnp.float32)
    n, d = h.shape
    l2 = params["w1a"].shape[1]
    c = params["w2c"].shape[1]
    # Lane-pad hidden width leaving at least one spare (zero) lane to stash the
    # attention logit in, and lane-pad the class width.
    l2p = _round_up(l2 + 1, 128)
    cp = _round_up(c, 128)

    # --- fuse / lane-pad parameters (cheap; in production precompute offline).
    wcat = jnp.concatenate(
        [_pad2(params["w1a"], d, l2p), _pad2(params["w1c"], d, l2p)], axis=1)  # (D, 2*L2p)
    b1a = _pad2(params["b1a"], 1, l2p)
    b1c = _pad2(params["b1c"], 1, l2p)
    w2a_row = _pad2(params["w2a"].T, 1, l2p)        # (1, L2p)
    b2a = params["b2a"].reshape(1, 1)
    w2c = _pad2(params["w2c"], l2p, cp)             # (L2p, Cp)  (row l2 and below zero-padded)
    b2c = _pad2(params["b2c"], 1, cp)

    # --- tile the patch axis; cap tile so estimated VMEM stays within budget.
    tn = min(_round_up(block_rows, 8), _round_up(n, 8))

    def _est_vmem(t):
        p1 = 4 * (2 * t * (d + l2p) + 2 * d * 2 * l2p + 2 * 8 * 128)
        p2 = 4 * (2 * t * (l2p + cp) + 2 * l2p * cp + 2 * 8 * cp)
        return max(p1, p2)

    while tn > 256 and _est_vmem(tn) > _VMEM_BUDGET:
        tn = _round_up(tn // 2, 8)

    np_rows = _round_up(n, tn)
    num_tiles = np_rows // tn
    if np_rows != n:
        h = jnp.pad(h, ((0, np_rows - n), (0, 0)))

    # --- pass 1 -------------------------------------------------------------
    p1_cost = pl.CostEstimate(
        flops=2 * np_rows * d * 2 * l2p + 4 * np_rows * l2p,
        transcendentals=np_rows * (l2p + 1),
        bytes_accessed=4 * (np_rows * d + d * 2 * l2p + np_rows * l2p
                            + num_tiles * 8 * 128))
    zlog, stats = pl.pallas_call(
        functools.partial(_addmil_pass1_kernel, l2=l2, l2p=l2p, tn=tn, n_valid=n),
        grid=(num_tiles,),
        in_specs=[
            pl.BlockSpec((tn, d), lambda i: (i, 0)),         # h tile (streamed)
            pl.BlockSpec((d, 2 * l2p), lambda i: (0, 0)),    # fused [w1a | w1c] (resident)
            pl.BlockSpec((1, l2p), lambda i: (0, 0)),        # b1a
            pl.BlockSpec((1, l2p), lambda i: (0, 0)),        # w2a as a row vector
            pl.BlockSpec((1, 1), lambda i: (0, 0)),          # b2a
        ],
        out_specs=(
            pl.BlockSpec((tn, l2p), lambda i: (i, 0)),       # [h@w1c with stashed logit]
            pl.BlockSpec((8, 128), lambda i: (i, 0)),        # per-tile softmax stats
        ),
        out_shape=(
            jax.ShapeDtypeStruct((np_rows, l2p), jnp.float32),
            jax.ShapeDtypeStruct((num_tiles * 8, 128), jnp.float32),
        ),
        compiler_params=pltpu.CompilerParams(
            dimension_semantics=("parallel",),
            vmem_limit_bytes=_VMEM_LIMIT),
        cost_estimate=p1_cost,
    )(h, wcat, b1a, w2a_row, b2a)

    # Tiny wrapper combine of per-tile softmax stats -> global max / inv-sum.
    stats_t = stats.reshape(num_tiles, 8, 128)[:, 0, :]      # (num_tiles, 128)
    m_i = stats_t[:, 0]
    s_i = stats_t[:, 1]
    m_glob = jnp.max(m_i)
    s_glob = jnp.sum(s_i * jnp.exp(m_i - m_glob))
    m_in = m_glob.reshape(1, 1)
    invs_in = (1.0 / s_glob).reshape(1, 1)

    # --- pass 2 -------------------------------------------------------------
    p2_cost = pl.CostEstimate(
        flops=2 * np_rows * l2p * cp + 6 * np_rows * l2p,
        transcendentals=np_rows * (cp + 1),
        bytes_accessed=4 * (np_rows * l2p + l2p * cp + np_rows * cp
                            + num_tiles * 8 * cp))
    pp_full, y_parts = pl.pallas_call(
        functools.partial(_addmil_pass2_kernel, l2=l2, l2p=l2p, cp=cp, tn=tn,
                          n_valid=n),
        grid=(num_tiles,),
        in_specs=[
            pl.BlockSpec((tn, l2p), lambda i: (i, 0)),       # streamed intermediate
            pl.BlockSpec((1, 1), lambda i: (0, 0)),          # global softmax max
            pl.BlockSpec((1, 1), lambda i: (0, 0)),          # 1 / global sum-exp
            pl.BlockSpec((1, l2p), lambda i: (0, 0)),        # b1c
            pl.BlockSpec((l2p, cp), lambda i: (0, 0)),       # w2c (lane-padded, resident)
            pl.BlockSpec((1, cp), lambda i: (0, 0)),         # b2c
        ],
        out_specs=(
            pl.BlockSpec((tn, cp), lambda i: (i, 0)),        # lane-dense patch preds
            pl.BlockSpec((8, cp), lambda i: (i, 0)),         # per-tile Y_prob partials
        ),
        out_shape=(
            jax.ShapeDtypeStruct((np_rows, cp), jnp.float32),
            jax.ShapeDtypeStruct((num_tiles * 8, cp), jnp.float32),
        ),
        compiler_params=pltpu.CompilerParams(
            dimension_semantics=("parallel",),
            vmem_limit_bytes=_VMEM_LIMIT),
        cost_estimate=p2_cost,
    )(zlog, m_in, invs_in, b1c, w2c, b2c)

    # Row 0 of each (8, Cp) tile block holds the exact per-tile partial sum.
    y_prob = jnp.sum(y_parts.reshape(num_tiles, 8, cp)[:, 0, :], axis=0)[:c]
    patch_preds = pp_full[:n, :c]
    y_hat = jnp.argmax(y_prob, axis=0)
    return {"Y_prob": y_prob, "Y_hat": y_hat, "patch_preds": patch_preds}


# --------------------------------------------------------------------------- #
# Params / reference                                                           #
# --------------------------------------------------------------------------- #
def init_params(key, num_features, num_classes):
    """Deterministic synthetic params. Weights stored transposed: (in, out)."""
    l2 = (num_features // 2) // 2
    ks = jax.random.split(key, 8)
    u = lambda k, shape, fan_in: jax.random.uniform(
        k, shape, jnp.float32, -1.0 / jnp.sqrt(fan_in), 1.0 / jnp.sqrt(fan_in))
    return {
        # attnT: Linear(D, L2), Linear(L2, 1)
        "w1a": u(ks[0], (num_features, l2), num_features),
        "b1a": u(ks[1], (1, l2), num_features),
        "w2a": u(ks[2], (l2, 1), l2),
        "b2a": u(ks[3], (1, 1), l2),
        # classifier: Linear(D, L2), Linear(L2, C)
        "w1c": u(ks[4], (num_features, l2), num_features),
        "b1c": u(ks[5], (1, l2), num_features),
        "w2c": u(ks[6], (l2, num_classes), l2),
        "b2c": u(ks[7], (1, num_classes), l2),
    }


def reference_forward(h, params):
    """Pure-JAX reference of the PyTorch forward, for sanity checking."""
    if h.ndim == 3:
        h = h[0]
    a1 = jnp.tanh(h @ params["w1a"] + params["b1a"])
    logits = a1 @ params["w2a"] + params["b2a"]
    at = jax.nn.softmax(logits, axis=0)
    gated = at * h
    c1 = jax.nn.relu(gated @ params["w1c"] + params["b1c"])
    pp = jnp.tanh(c1 @ params["w2c"] + params["b2c"])
    y_prob = jnp.sum(pp, axis=0)
    return {"Y_prob": y_prob, "Y_hat": jnp.argmax(y_prob, axis=0), "patch_preds": pp}


if __name__ == "__main__":
    # Config 1: small shapes consistent with the module (N=8 patches, D=32 -> L2=8).
    NUM_FEATURES, NUM_CLASSES, N_PATCHES = 32, 2, 8

    key = jax.random.PRNGKey(0)
    k_h, k_p, k_rest = jax.random.split(key, 3)
    h = jax.random.normal(k_h, (1, N_PATCHES, NUM_FEATURES), dtype=jnp.float32)
    params = init_params(k_p, NUM_FEATURES, NUM_CLASSES)

    out = addmil_forward(h, params)
    jax.block_until_ready(out)

    ref = reference_forward(h, params)
    assert jnp.allclose(out["Y_prob"], ref["Y_prob"], atol=1e-4), "Y_prob mismatch"
    assert jnp.allclose(out["patch_preds"], ref["patch_preds"], atol=1e-4), "patch_preds mismatch"
    assert int(out["Y_hat"]) == int(ref["Y_hat"]), "Y_hat mismatch"

    # Config 2: multi-tile grid with a ragged last tile (exercises streaming,
    # masking, and the wrapper-side per-tile softmax-stat combine).
    NF2, NC2, N2 = 64, 3, 200
    k_h2, k_p2 = jax.random.split(k_rest)
    h2 = jax.random.normal(k_h2, (1, N2, NF2), dtype=jnp.float32)
    params2 = init_params(k_p2, NF2, NC2)
    out2 = addmil_forward(h2, params2, block_rows=64)
    jax.block_until_ready(out2)
    ref2 = reference_forward(h2, params2)
    assert jnp.allclose(out2["Y_prob"], ref2["Y_prob"], atol=1e-4), "Y_prob mismatch (2)"
    assert jnp.allclose(out2["patch_preds"], ref2["patch_preds"], atol=1e-4), "patch_preds mismatch (2)"
    assert int(out2["Y_hat"]) == int(ref2["Y_hat"]), "Y_hat mismatch (2)"

    print("KERNEL_OK")
</pallas_src>

<mosaic_0001>
module attributes {stable_mosaic.version = 11 : i64} {
  func.func @_addmil_pass1_kernel(%arg0: i32, %arg1: memref<8x32xf32, #tpu.memory_space<vmem>>, %arg2: memref<32x256xf32, #tpu.memory_space<vmem>>, %arg3: memref<1x128xf32, #tpu.memory_space<vmem>>, %arg4: memref<1x128xf32, #tpu.memory_space<vmem>>, %arg5: memref<1x1xf32, #tpu.memory_space<vmem>>, %arg6: memref<8x128xf32, #tpu.memory_space<vmem>>, %arg7: memref<8x128xf32, #tpu.memory_space<vmem>>) attributes {dimension_semantics = [#tpu.dimension_semantics<parallel>], iteration_bounds = array<i64: 1>, scalar_prefetch = 0 : i64, scratch_operands = 0 : i64, tpu.core_type = #tpu.core_type<tc>, window_params = [{transform_indices = @transform_0, window_bounds = array<i64: 8, 32>}, {pipeline_mode = #tpu.pipeline_mode<synchronous>, transform_indices = @transform_1, window_bounds = array<i64: 32, 256>}, {pipeline_mode = #tpu.pipeline_mode<synchronous>, transform_indices = @transform_2, window_bounds = array<i64: 1, 128>}, {pipeline_mode = #tpu.pipeline_mode<synchronous>, transform_indices = @transform_3, window_bounds = array<i64: 1, 128>}, {pipeline_mode = #tpu.pipeline_mode<synchronous>, transform_indices = @transform_4, window_bounds = array<i64: 1, 1>}, {transform_indices = @transform_5, window_bounds = array<i64: 8, 128>}, {transform_indices = @transform_6, window_bounds = array<i64: 8, 128>}]} {
    %c0 = arith.constant 0 : index
    %c0_0 = arith.constant 0 : index
    %0 = vector.load %arg1[%c0, %c0_0] : memref<8x32xf32, #tpu.memory_space<vmem>>, vector<8x32xf32>
    %c0_1 = arith.constant 0 : index
    %c0_2 = arith.constant 0 : index
    %1 = vector.load %arg2[%c0_1, %c0_2] : memref<32x256xf32, #tpu.memory_space<vmem>>, vector<32x256xf32>
    %cst = arith.constant dense<0.000000e+00> : vector<8x256xf32>
    %2 = tpu.matmul %0, %1, %cst {dimension_numbers = #tpu.dot_dimension_numbers<[1], [0], [0], [1], [0, 0, 1, 1], [], []>} : vector<8x32xf32>, vector<32x256xf32>, vector<8x256xf32> -> vector<8x256xf32>
    %3 = vector.extract_strided_slice %2 {offsets = [0, 0], sizes = [8, 128], strides = [1, 1]} : vector<8x256xf32> to vector<8x128xf32>
    %c0_3 = arith.constant 0 : index
    %c0_4 = arith.constant 0 : index
    %4 = vector.load %arg3[%c0_3, %c0_4] : memref<1x128xf32, #tpu.memory_space<vmem>>, vector<1x128xf32>
    %5 = vector.broadcast %4 : vector<1x128xf32> to vector<8x128xf32>
    %6 = arith.addf %3, %5 : vector<8x128xf32>
    %7 = math.tanh %6 : vector<8x128xf32>
    %8 = vector.extract_strided_slice %2 {offsets = [0, 128], sizes = [8, 128], strides = [1, 1]} : vector<8x256xf32> to vector<8x128xf32>
    %c0_5 = arith.constant 0 : index
    %c0_6 = arith.constant 0 : index
    %9 = vector.load %arg4[%c0_5, %c0_6] : memref<1x128xf32, #tpu.memory_space<vmem>>, vector<1x128xf32>
    %10 = vector.broadcast %9 : vector<1x128xf32> to vector<8x128xf32>
    %11 = arith.mulf %7, %10 : vector<8x128xf32>
    %cst_7 = arith.constant dense<0.000000e+00> : vector<8xf32>
    %12 = vector.multi_reduction <add>, %11, %cst_7 [1] : vector<8x128xf32> to vector<8xf32>
    %13 = vector.shape_cast %12 : vector<8xf32> to vector<8x1xf32>
    %c0_8 = arith.constant 0 : index
    %c0_9 = arith.constant 0 : index
    %14 = vector.load %arg5[%c0_8, %c0_9] : memref<1x1xf32, #tpu.memory_space<vmem>>, vector<1x1xf32>
    %15 = vector.broadcast %14 : vector<1x1xf32> to vector<8x1xf32>
    %16 = arith.addf %13, %15 : vector<8x1xf32>
    %c8_i32 = arith.constant 8 : i32
    %17 = arith.muli %arg0, %c8_i32 : i32
    %18 = tpu.iota {dimensions = array<i32: 0>} : vector<8x1xi32>
    %19 = vector.broadcast %17 : i32 to vector<8x1xi32>
    %20 = arith.addi %19, %18 : vector<8x1xi32>
    %c8_i32_10 = arith.constant 8 : i32
    %21 = vector.broadcast %c8_i32_10 : i32 to vector<8x1xi32>
    %22 = arith.cmpi slt, %20, %21 : vector<8x1xi32>
    %cst_11 = arith.constant -1.000000e+30 : f32
    %23 = vector.broadcast %cst_11 : f32 to vector<8x1xf32>
    %24 = arith.select %22, %16, %23 : vector<8x1xi1>, vector<8x1xf32>
    %25 = vector.shape_cast %24 : vector<8x1xf32> to vector<1x8x1xf32>
    %cst_12 = arith.constant dense<0xFF800000> : vector<1xf32>
    %26 = vector.multi_reduction <maximumf>, %25, %cst_12 [1, 2] : vector<1x8x1xf32> to vector<1xf32>
    %27 = vector.shape_cast %26 : vector<1xf32> to vector<1x1x1xf32>
    %28 = vector.extract %27[0, 0, 0] : f32 from vector<1x1x1xf32>
    %29 = vector.broadcast %28 : f32 to vector<8x1xf32>
    %30 = arith.subf %24, %29 : vector<8x1xf32>
    %31 = math.exp %30 : vector<8x1xf32>
    %32 = vector.shape_cast %31 : vector<8x1xf32> to vector<1x8x1xf32>
    %cst_13 = arith.constant dense<0.000000e+00> : vector<1xf32>
    %33 = vector.multi_reduction <add>, %32, %cst_13 [1, 2] : vector<1x8x1xf32> to vector<1xf32>
    %34 = vector.shape_cast %33 : vector<1xf32> to vector<1x1x1xf32>
    %35 = vector.extract %34[0, 0, 0] : f32 from vector<1x1x1xf32>
    %36 = tpu.iota {dimensions = array<i32: 1>} : vector<8x128xi32>
    %c0_i32 = arith.constant 0 : i32
    %37 = vector.broadcast %c0_i32 : i32 to vector<8x128xi32>
    %38 = arith.cmpi eq, %36, %37 : vector<8x128xi32>
    %39 = vector.broadcast %28 : f32 to vector<8x128xf32>
    %40 = vector.broadcast %35 : f32 to vector<8x128xf32>
    %41 = arith.select %38, %39, %40 : vector<8x128xi1>, vector<8x128xf32>
    %c0_14 = arith.constant 0 : index
    %c0_15 = arith.constant 0 : index
    %42 = vector.load %arg7[%c0_14, %c0_15] : memref<8x128xf32, #tpu.memory_space<vmem>>, vector<8x128xf32>
    tpu.vector_store %arg7[%c0_14, %c0_15], %41 {strides = array<i32>} : memref<8x128xf32, #tpu.memory_space<vmem>>, vector<8x128xf32>,
    %43 = tpu.iota {dimensions = array<i32: 1>} : vector<8x128xi32>
    %c8_i32_16 = arith.constant 8 : i32
    %44 = vector.broadcast %c8_i32_16 : i32 to vector<8x128xi32>
    %45 = arith.cmpi eq, %43, %44 : vector<8x128xi32>
    %46 = vector.shape_cast %24 : vector<8x1xf32> to vector<8x1xf32>
    %47 = vector.broadcast %46 : vector<8x1xf32> to vector<8x128xf32>
    %48 = arith.select %45, %47, %8 : vector<8x128xi1>, vector<8x128xf32>
    %c0_17 = arith.constant 0 : index
    %c0_18 = arith.constant 0 : index
    %49 = vector.load %arg6[%c0_17, %c0_18] : memref<8x128xf32, #tpu.memory_space<vmem>>, vector<8x128xf32>
    tpu.vector_store %arg6[%c0_17, %c0_18], %48 {strides = array<i32>} : memref<8x128xf32, #tpu.memory_space<vmem>>, vector<8x128xf32>,
    return
  }
  func.func @transform_0(%arg0: i32) -> (i32, i32) {
    %c0_i32 = arith.constant 0 : i32
    %c0_i32_0 = arith.constant 0 : i32
    return %arg0, %c0_i32 : i32, i32
  }
  func.func @transform_1(%arg0: i32) -> (i32, i32) {
    %c0_i32 = arith.constant 0 : i32
    %c0_i32_0 = arith.constant 0 : i32
    %c0_i32_1 = arith.constant 0 : i32
    return %c0_i32, %c0_i32_0 : i32, i32
  }
  func.func @transform_2(%arg0: i32) -> (i32, i32) {
    %c0_i32 = arith.constant 0 : i32
    %c0_i32_0 = arith.constant 0 : i32
    %c0_i32_1 = arith.constant 0 : i32
    return %c0_i32, %c0_i32_0 : i32, i32
  }
  func.func @transform_3(%arg0: i32) -> (i32, i32) {
    %c0_i32 = arith.constant 0 : i32
    %c0_i32_0 = arith.constant 0 : i32
    %c0_i32_1 = arith.constant 0 : i32
    return %c0_i32, %c0_i32_0 : i32, i32
  }
  func.func @transform_4(%arg0: i32) -> (i32, i32) {
    %c0_i32 = arith.constant 0 : i32
    %c0_i32_0 = arith.constant 0 : i32
    %c0_i32_1 = arith.constant 0 : i32
    return %c0_i32, %c0_i32_0 : i32, i32
  }
  func.func @transform_5(%arg0: i32) -> (i32, i32) {
    %c0_i32 = arith.constant 0 : i32
    %c0_i32_0 = arith.constant 0 : i32
    return %arg0, %c0_i32 : i32, i32
  }
  func.func @transform_6(%arg0: i32) -> (i32, i32) {
    %c0_i32 = arith.constant 0 : i32
    %c0_i32_0 = arith.constant 0 : i32
    return %arg0, %c0_i32 : i32, i32
  }
}

</mosaic_0001>

<bundles_post_ra>
// kernel: tpu_custom_call.1
= control target key start
LH: loop header
LB: loop body
LE: loop exit
PB: predicated region body
PF: predicated region fallthrough
CT: control target
= control target key end

     0   :  { %s477_s0 = inlined_call_operand.hbm [shape: f32[8,32], index: 0, kind: input, shape index: {}]   ;;  %s478_s1 = inlined_call_operand.hbm [shape: f32[32,256], index: 1, kind: input, shape index: {}]   ;;  %s479_s2 = inlined_call_operand.vmem [shape: f32[1,128], index: 2, kind: input, shape index: {}]   ;;  %s480_s3 = inlined_call_operand.vmem [shape: f32[1,128], index: 3, kind: input, shape index: {}]   ;;  %s481_s4 = inlined_call_operand.<no memory space> [shape: f32[1,1], index: 4, kind: input, shape index: {}]   ;;  %s482_s5 = inlined_call_operand.hbm [shape: f32[8,128], index: 5, kind: output, shape index: {0}]   ;;  %s483_s6 = inlined_call_operand.hbm [shape: f32[8,128], index: 6, kind: output, shape index: {1}]  }
   0x1   :  { %v12_v0 = vstv %s481_s4 }
   0x2   :  { %13 = vst [vmem:[#allocation2] sm:$0x1] %v12_v0 }
   0x3   :  { %14 = vsyncpa [#allocation4], 0 }
   0x4   :  { %15 = vsyncpa [#allocation7], 0 }
   0x5   :  { %16 = vsyncpa [#allocation5], 0 }
   0x6   :  { %17 = vsyncpa [#allocation10], 0  ;;  %s365_s23 = smov [#allocation3]   ;;  %s366_s25 = smov [#allocation6]  }
   0x7   :  { %s24_s24 = sshll.u32 %s365_s23, 4  ;;  %s33_s26 = sshll.u32 %s366_s25, 4  ;;  %s25_s24 = int_to_ptr.vmem [resolvable:$true] %s24_s24  ;;  %s411_s26 = int_to_ptr.vmem [resolvable:$true] %s33_s26 }
   0x8   :  { %s269_s29 = scalar_lea.hbm %s477_s0, 128 }
   0x9   :  { %p270_p0 = scmp.ne.s32.totalorder %s477_s0, %s269_s29  ;;  %p273_p1 = scmp.lt.u32.totalorder %s269_s29, %s477_s0 }
   0xb   :  { %p275_p2 = pnand %p273_p1, %p270_p0 }
   0xd   :  { %278 = shalt.err (!%p275_p2)
}
   0xe   :  { %s279_s9 = scalar_lea.vmem %s25_s24, 128  ;;  %p284_p4 = scmp.lt.s32.totalorder %s25_s24, %s25_s24 }
   0xf   :  { %p280_p3 = scmp.ne.s32.totalorder %s25_s24, %s279_s9  ;;  %p285_p5 = scmp.lt.s32.totalorder %s279_s9, %s279_s9 }
  0x11   :  { %p286_p6 = por %p285_p5, %p284_p4 }
  0x13   :  { %p287_p7 = pnand %p286_p6, %p280_p3 }
  0x15   :  { %290 = shalt.err (!%p287_p7)
}
  0x16   :  { %27 = dma.hbm_to_vmem [thread:$0]  %s477_s0, 128, %s25_s24, [#allocation4]  }
  0x17   :  { %s291_s14 = scalar_lea.hbm %s478_s1, 1024 }
  0x18   :  { %p292_p8 = scmp.ne.s32.totalorder %s478_s1, %s291_s14  ;;  %p295_p9 = scmp.lt.u32.totalorder %s291_s14, %s478_s1 }
  0x1a   :  { %p297_p10 = pnand %p295_p9, %p292_p8 }
  0x1c   :  { %300 = shalt.err (!%p297_p10)
}
  0x1d   :  { %s301_s19 = scalar_lea.vmem %s411_s26, 1024  ;;  %p306_p12 = scmp.lt.s32.totalorder %s411_s26, %s411_s26 }
  0x1e   :  { %p302_p11 = scmp.ne.s32.totalorder %s411_s26, %s301_s19  ;;  %p307_p13 = scmp.lt.s32.totalorder %s301_s19, %s301_s19 }
  0x20   :  { %p308_p0 = por %p307_p13, %p306_p12 }
  0x22   :  { %p309_p1 = pnand %p308_p0, %p302_p11 }
  0x24   :  { %312 = shalt.err (!%p309_p1)
}
  0x25   :  { %s367_s0 = smov 256   ;;  %s368_s20 = smov 16  }
  0x26   :  { %39 = dma.hbm_to_vmem [thread:$0]  %s478_s1, 1024, %s411_s26, [#allocation7], %s367_s0, %s367_s0, %s368_s20  }
  0x27   :  { %357 = dma.done.wait [#allocation4], 128  }
  0x28   :  { %358 = vsyncadd [#allocation4], 4294967168 }
  0x29   :  { %359 = dma.done.wait [#allocation7], 1024  }
  0x2a   :  { %360 = vsyncadd [#allocation7], 4294966272  ;;  %v369_v1 = vmov 0.0   ;;  %v54_v2 = vld [vmem:[#allocation6 + $0x8] sm:$0xff]  ;;  %v56_v3 = vld [vmem:[#allocation6 + $0x18] sm:$0xff]  ;;  %vm61_vm0 = vcmask 261120   ;;  %v195_v39 = vlaneseq }
  0x2b   :  { %129 = vmatprep.mubr.f32.mxu0 %v369_v1  ;;  %v53_v4 = vld [vmem:[#allocation6] sm:$0xff]  ;;  %v243_v5 = vpack.c.bf16 %v56_v3, %v54_v2  ;;  %v55_v6 = vld [vmem:[#allocation6 + $0x10] sm:$0xff]  ;;  %v58_v7 = vld [vmem:[#allocation6 + $0x28] sm:$0xff]  ;;  %vm170_vm1 = vcmask 7168   ;;  %v370_v26 = vmov 0  }
  0x2c   :  { %v60_v8 = vld [vmem:[#allocation6 + $0x38] sm:$0xff]  ;;  %v245_v9 = vpack.c.bf16 %v55_v6, %v53_v4  ;;  %v57_v11 = vld [vmem:[#allocation6 + $0x20] sm:$0xff]  ;;  %v59_v12 = vld [vmem:[#allocation6 + $0x30] sm:$0xff]  ;;  %263 = vset.pattern.permute.xlu1 %v370_v26  ;;  %264 = vset.pattern.permute.xlu0 %v370_v26  ;;  %v196_v40 = vand.u32 127, %v195_v39 }
  0x2d   :  { %v247_v10 = vpack.c.bf16 %v60_v8, %v58_v7  ;;  %244 = vmatprep.subr.bf16.mxu0 %v243_v5  ;;  %v249_v13 = vpack.c.bf16 %v59_v12, %v57_v11  ;;  %v52_v14 = vld [vmem:[#allocation3] sm:$0xff]  ;;  %v240_v15 = vld [vmem:[%s479_s2] ss:$0 sm:$0xff] }
  0x2e   :  { %246 = vmatpush1.bf16.msra.mxu0 %v245_v9  ;;  %v241_v19 = vld [vmem:[%s480_s3] ss:$0 sm:$0xff]  ;;  %s371_s3 = smov [#allocation8]   ;;  %vm201_vm2 = vcmp.eq.s32.totalorder %v196_v40, 8 }
  0x2f   :  { %248 = vmatprep.subr.bf16.mxu0 %v247_v10  ;;  %v242_v22 = vld [vmem:[#allocation2] ss:$0 sm:$0xff]  ;;  %s215_s26 = sshll.u32 %s371_s3, 4  ;;  %s216_s26 = int_to_ptr.vmem [resolvable:$true] %s215_s26 }
  0x30   :  { %s313_s27 = scalar_lea.vmem %s216_s26, 128  ;;  %p318_p3 = scmp.lt.s32.totalorder %s216_s26, %s216_s26 }
  0x31   :  { %p314_p2 = scmp.ne.s32.totalorder %s216_s26, %s313_s27  ;;  %p319_p4 = scmp.lt.s32.totalorder %s313_s27, %s313_s27 }
  0x32   :  { %250 = vmatpush1.bf16.msra.mxu0 %v249_v13 }
  0x33   :  { %p320_p5 = por %p319_p4, %p318_p3 }
  0x35   :  { %239 = vmatmul.mubr.msk.f32.vlgmr.msra.gmra.mrb[0].mxu0 %vm61_vm0, %v52_v14  ;;  %p321_p6 = pnand %p320_p5, %p314_p2 }
 0x108   :  { %v131_v16 = vpop.f32.mrb[0].mxu0 }
 0x109   :  { %v143_v17 = vadd.f32 %v240_v15, %v131_v16  ;;  %v133_v18 = vpop.f32.mrb[1].mxu0 }
 0x10b   :  { %265 = vtanh.f32 %v143_v17 }
 0x115   :  { %v266_v20 = vpop.eup %265 }
 0x116   :  { %v152_v21 = vmul.f32 %v266_v20, %v241_v19 }
 0x118   :  { %153 = vadd.xlane.f32.xlu0 %v152_v21 }
 0x1a5   :  { %v154_v23 = vpop.xlane.xlu0 %153 }
 0x1a6   :  { %v162_v24 = vadd.f32 %v242_v22, %v154_v23 }
 0x1a8   :  { %v171_v25 = vsel %vm170_vm1, %v162_v24, -inf }
 0x1a9   :  { %172 = vmax.xlane.f32.xlu0 %v171_v25 }
 0x236   :  { %v173_v27 = vpop.xlane.xlu0 %172 }
 0x237   :  { %v174_v28 = vrot.slane %v173_v27, 4 }
 0x239   :  { %v175_v29 = vmax.f32 %v173_v27, %v174_v28 }
 0x23b   :  { %v176_v30 = vrot.slane %v175_v29, 2 }
 0x23d   :  { %v177_v31 = vmax.f32 %v175_v29, %v176_v30 }
 0x23f   :  { %v178_v32 = vrot.slane %v177_v31, 1 }
 0x241   :  { %v179_v33 = vmax.f32 %v177_v31, %v178_v32 }
 0x243   :  { %251 = vpush %v179_v33 }
 0x274   :  { %s449_s2 = spop %251 }
 0x275   :  { %v181_v34 = vstv %s449_s2 }
 0x276   :  { %v182_v35 = vsub.f32 %v162_v24, %v181_v34 }
 0x278   :  { %v183_v36 = vmul.f32 1.442695, %v182_v35 }
 0x27a   :  { %267 = vpow2.f32 %v183_v36 }
 0x284   :  { %v268_v37 = vpop.eup %267 }
 0x285   :  { %v185_v38 = vsel %vm170_vm1, %v268_v37, 0.0 }
 0x286   :  { %186 = vadd.xlane.f32.xlu1 %v185_v38 }
 0x297   :  { %204 = vperm.xlu1 %263, %v162_v24  }
 0x313   :  { %v187_v41 = vpop.xlane.xlu1 %186 }
 0x314   :  { %v188_v42 = vrot.slane %v187_v41, 4 }
 0x316   :  { %v189_v43 = vadd.f32 %v188_v42, %v187_v41 }
 0x317   :  { %v205_v44 = vpop.permute.xlu1 %204 }
 0x318   :  { %v190_v45 = vrot.slane %v189_v43, 2  ;;  %v207_v46 = vsel %vm201_vm2, %v205_v44, %v133_v18 }
 0x319   :  { %208 = vst [vmem:[#allocation8] sm:$0xff] %v207_v46 }
 0x31a   :  { %v191_v47 = vadd.f32 %v190_v45, %v189_v43 }
 0x31b   :  { %324 = shalt.err (!%p321_p6)
}
 0x31c   :  { %s325_s30 = scalar_lea.hbm %s482_s5, 128 }
 0x31d   :  { %p326_p7 = scmp.ne.s32.totalorder %s482_s5, %s325_s30  ;;  %p329_p8 = scmp.lt.u32.totalorder %s325_s30, %s482_s5 }
 0x31f   :  { %p331_p9 = pnand %p329_p8, %p326_p7 }
 0x321   :  { %334 = shalt.err (!%p331_p9)
}
 0x322   :  { %218 = dma.vmem_to_hbm [thread:$0]  %s216_s26, 128, %s482_s5, [#allocation5]   ;;  %v192_v48 = vrot.slane %v191_v47, 1  ;;  %vm197_vm3 = vcmp.eq.s32.totalorder %v196_v40, 0 }
 0x323   :  { %s372_s12 = smov [#allocation9]  }
 0x324   :  { %v193_v49 = vadd.f32 %v192_v48, %v191_v47  ;;  %s225_s13 = sshll.u32 %s372_s12, 4  ;;  %s226_s13 = int_to_ptr.vmem [resolvable:$true] %s225_s13 }
 0x325   :  { %s335_s15 = scalar_lea.vmem %s226_s13, 128  ;;  %p340_p11 = scmp.lt.s32.totalorder %s226_s13, %s226_s13 }
 0x326   :  { %253 = vpush %v193_v49  ;;  %p336_p10 = scmp.ne.s32.totalorder %s226_s13, %s335_s15  ;;  %p341_p12 = scmp.lt.s32.totalorder %s335_s15, %s335_s15 }
 0x328   :  { %p342_p13 = por %p341_p12, %p340_p11 }
 0x32a   :  { %p343_p0 = pnand %p342_p13, %p336_p10 }
 0x357   :  { %s254_s14 = spop %253 }
 0x358   :  { %v198_v50 = vstv %s254_s14 }
 0x359   :  { %v199_v51 = vsel %vm197_vm3, %v181_v34, %v198_v50 }
 0x35a   :  { %200 = vst [vmem:[#allocation9] sm:$0xff] %v199_v51 }
 0x35b   :  { %346 = shalt.err (!%p343_p0)
}
 0x35c   :  { %s347_s17 = scalar_lea.hbm %s483_s6, 128 }
 0x35d   :  { %p348_p1 = scmp.ne.s32.totalorder %s483_s6, %s347_s17  ;;  %p351_p2 = scmp.lt.u32.totalorder %s347_s17, %s483_s6 }
 0x35f   :  { %p353_p3 = pnand %p351_p2, %p348_p1 }
 0x361   :  { %356 = shalt.err (!%p353_p3)
}
 0x362   :  { %228 = dma.vmem_to_hbm [thread:$0]  %s226_s13, 128, %s483_s6, [#allocation10]  }
 0x363   :  { %361 = dma.done.wait [#allocation5], 128  }
 0x364   :  { %362 = vsyncadd [#allocation5], 4294967168 }
 0x365   :  { %363 = dma.done.wait [#allocation10], 128  }
 0x366   :  { %364 = vsyncadd [#allocation10], 4294967168 }
 0x367   :  { %235 = vsyncpa [#allocation4], 1 }
 0x368   :  { %236 = vsyncpa [#allocation7], 1 }
 0x369   :  { %237 = vsyncpa [#allocation5], 1 }
 0x36a   :  { %238 = vsyncpa [#allocation10], 1 }

</bundles_post_ra>
